<compile_context>
chip_gen: v7x
topology: tpu7x:2x2x1
jax: 0.10.0
libtpu: 0.0.40
codegen_flags: <defaults>
</compile_context>

<pallas_src>
import jax
import jax.numpy as jnp
from jax import lax
from jax.experimental import pallas as pl
from jax.experimental.pallas import tpu as pltpu

# ---------------- small synthetic config ----------------
VOCAB = 64          # config.vocab_size
MAX_POS = 32        # config.max_position_embeddings
TYPE_VOCAB = 2      # config.type_vocab_size
HIDDEN = 128        # config.hidden_size
PAD_ID = 0          # config.pad_token_id
EPS = 1e-12         # config.layer_norm_eps
B = 2               # batch
S = 8               # sequence length


def bert_embeddings_kernel(ids_ref, tts_ref, word_ref, pos_ref, tok_ref,
                           gamma_ref, beta_ref, out_ref):
    """Single grid step over the flattened (rows = B*S, H) problem.

    ids_ref   : (rows, 1) int32   token ids (column vector, lane-broadcastable)
    tts_ref   : (rows, 1) int32   token type ids
    word_ref  : (V, H)    bf16    word embedding table (MXU operand)
    pos_ref   : (rows, H) f32     position embedding rows, pre-tiled per batch
    tok_ref   : (T, H)    f32     token-type embedding table (VPU operand)
    gamma_ref : (1, H)    f32     LayerNorm weight
    beta_ref  : (1, H)    f32     LayerNorm bias
    out_ref   : (rows, H) f32     output slab (lane-dense)
    """
    rows = ids_ref.shape[0]
    V = word_ref.shape[0]
    T = tok_ref.shape[0]

    # --- word embedding gather: (rows, V) one-hot x (V, H) table on the MXU ---
    ids = ids_ref[...]                                               # (rows, 1)
    iota_v = lax.broadcasted_iota(jnp.int32, (rows, V), 1)           # (rows, V)
    onehot = (iota_v == ids).astype(word_ref.dtype)                  # bf16, exact 0/1
    word_emb = jnp.dot(onehot, word_ref[...],
                       preferred_element_type=jnp.float32)           # (rows, H) f32

    # --- sum of embeddings (f32, VPU) ---
    x = word_emb + pos_ref[...]                                      # (rows, H)

    # token-type gather as a VPU masked sum over the T (=2) table rows.
    tts = tts_ref[...]                                               # (rows, 1)
    tok = tok_ref[...]                                               # (T, H) f32
    for t in range(T):                                               # static unroll
        x = x + (tts == t).astype(jnp.float32) * tok[t:t + 1, :]

    # utterance_type_ids is None in this path -> utterance term is exactly 0.

    # --- LayerNorm over hidden (reduce on XLU, rsqrt on EUP, gamma folded) ---
    mean = jnp.mean(x, axis=-1, keepdims=True)
    xc = x - mean
    var = jnp.mean(xc * xc, axis=-1, keepdims=True)
    scale = lax.rsqrt(var + EPS) * gamma_ref[...]                    # (rows, H)
    y = xc * scale + beta_ref[...]

    # dropout: inference mode -> identity
    out_ref[...] = y.astype(out_ref.dtype)


def bert_embeddings(input_ids, token_type_ids, word_table, pos_table,
                    tok_table, gamma, beta):
    """Wrapper: layout plumbing in JAX, hot path in one Pallas call."""
    Bsz, Slen = input_ids.shape
    H = word_table.shape[1]
    rows = Bsz * Slen

    ids2 = input_ids.reshape(rows, 1).astype(jnp.int32)
    tts2 = token_type_ids.reshape(rows, 1).astype(jnp.int32)
    word_bf16 = word_table.astype(jnp.bfloat16)          # bf16 for the MXU
    pos_tiled = jnp.tile(pos_table[:Slen], (Bsz, 1))     # position_ids = arange(S)
    tok_f32 = tok_table.astype(jnp.float32)
    gamma2 = gamma.reshape(1, H)
    beta2 = beta.reshape(1, H)

    grid_spec = pltpu.PrefetchScalarGridSpec(
        num_scalar_prefetch=0,
        grid=(1,),                                       # single step: no grid overhead
        in_specs=[
            pl.BlockSpec((rows, 1), lambda i: (0, 0)),           # ids (column)
            pl.BlockSpec((rows, 1), lambda i: (0, 0)),           # token type ids
            pl.BlockSpec(word_bf16.shape, lambda i: (0, 0)),     # word table (bf16)
            pl.BlockSpec((rows, H), lambda i: (0, 0)),           # position rows
            pl.BlockSpec(tok_f32.shape, lambda i: (0, 0)),       # token-type table
            pl.BlockSpec((1, H), lambda i: (0, 0)),              # LN gamma
            pl.BlockSpec((1, H), lambda i: (0, 0)),              # LN beta
        ],
        out_specs=pl.BlockSpec((rows, H), lambda i: (0, 0)),
    )

    out2 = pl.pallas_call(
        bert_embeddings_kernel,
        out_shape=jax.ShapeDtypeStruct((rows, H), jnp.float32),
        grid_spec=grid_spec,
        compiler_params=pltpu.CompilerParams(
            dimension_semantics=("arbitrary",)),
    )(ids2, tts2, word_bf16, pos_tiled, tok_f32, gamma2, beta2)

    return out2.reshape(Bsz, Slen, H)


def reference(input_ids, token_type_ids, word_table_q, pos_table, tok_table,
              gamma, beta):
    """Pure-JAX reference. Uses the same (bf16-quantized) word table the kernel
    feeds the MXU, so the comparison is exact up to f32 reduce ordering."""
    we = word_table_q[input_ids]                                  # (B, S, H)
    pe = pos_table[jnp.arange(input_ids.shape[1])][None, :, :]    # (1, S, H)
    te = tok_table[token_type_ids]                                # (B, S, H)
    x = we + pe + te                                              # utterance term = 0
    mean = x.mean(-1, keepdims=True)
    var = ((x - mean) ** 2).mean(-1, keepdims=True)
    return (x - mean) * lax.rsqrt(var + EPS) * gamma + beta


if __name__ == "__main__":
    key = jax.random.PRNGKey(0)
    k_w, k_p, k_t, k_ids = jax.random.split(key, 4)

    # deterministic parameter init (shapes from the module __init__)
    word_table = 0.02 * jax.random.normal(k_w, (VOCAB, HIDDEN), jnp.float32)
    word_table = word_table.at[PAD_ID].set(0.0)          # padding_idx row zeroed
    pos_table = 0.02 * jax.random.normal(k_p, (MAX_POS, HIDDEN), jnp.float32)
    tok_table = 0.02 * jax.random.normal(k_t, (TYPE_VOCAB, HIDDEN), jnp.float32)
    # utterance_type_embeddings (2, HIDDEN) exists in __init__ but contributes 0
    # in the utterance_type_ids=None path exercised here.
    gamma = jnp.ones((HIDDEN,), jnp.float32)              # nn.LayerNorm default init
    beta = jnp.zeros((HIDDEN,), jnp.float32)

    input_ids = jax.random.randint(k_ids, (B, S), 1, VOCAB, dtype=jnp.int32)
    token_type_ids = jnp.zeros((B, S), jnp.int32)         # forward default when None

    out = bert_embeddings(input_ids, token_type_ids, word_table, pos_table,
                          tok_table, gamma, beta)
    out = jax.block_until_ready(out)

    # reference with the same bf16-quantized word table the kernel uses
    word_q = word_table.astype(jnp.bfloat16).astype(jnp.float32)
    ref = reference(input_ids, token_type_ids, word_q, pos_table, tok_table,
                    gamma, beta)
    assert out.shape == (B, S, HIDDEN)
    assert jnp.allclose(out, ref, atol=1e-5, rtol=1e-5), "mismatch vs reference"
    print("KERNEL_OK")
</pallas_src>

<mosaic_0001>
module attributes {stable_mosaic.version = 11 : i64} {
  func.func @bert_embeddings_kernel(%arg0: i32, %arg1: memref<16x1xi32, #tpu.memory_space<vmem>>, %arg2: memref<16x1xi32, #tpu.memory_space<vmem>>, %arg3: memref<64x128xbf16, #tpu.memory_space<vmem>>, %arg4: memref<16x128xf32, #tpu.memory_space<vmem>>, %arg5: memref<2x128xf32, #tpu.memory_space<vmem>>, %arg6: memref<1x128xf32, #tpu.memory_space<vmem>>, %arg7: memref<1x128xf32, #tpu.memory_space<vmem>>, %arg8: memref<16x128xf32, #tpu.memory_space<vmem>>) attributes {dimension_semantics = [#tpu.dimension_semantics<arbitrary>], iteration_bounds = array<i64: 1>, scalar_prefetch = 0 : i64, scratch_operands = 0 : i64, tpu.core_type = #tpu.core_type<tc>, window_params = [{pipeline_mode = #tpu.pipeline_mode<synchronous>, transform_indices = @transform_0, window_bounds = array<i64: 16, 1>}, {pipeline_mode = #tpu.pipeline_mode<synchronous>, transform_indices = @transform_1, window_bounds = array<i64: 16, 1>}, {pipeline_mode = #tpu.pipeline_mode<synchronous>, transform_indices = @transform_2, window_bounds = array<i64: 64, 128>}, {pipeline_mode = #tpu.pipeline_mode<synchronous>, transform_indices = @transform_3, window_bounds = array<i64: 16, 128>}, {pipeline_mode = #tpu.pipeline_mode<synchronous>, transform_indices = @transform_4, window_bounds = array<i64: 2, 128>}, {pipeline_mode = #tpu.pipeline_mode<synchronous>, transform_indices = @transform_5, window_bounds = array<i64: 1, 128>}, {pipeline_mode = #tpu.pipeline_mode<synchronous>, transform_indices = @transform_6, window_bounds = array<i64: 1, 128>}, {pipeline_mode = #tpu.pipeline_mode<synchronous>, transform_indices = @transform_7, window_bounds = array<i64: 16, 128>}]} {
    %c0 = arith.constant 0 : index
    %c0_0 = arith.constant 0 : index
    %0 = vector.load %arg1[%c0, %c0_0] : memref<16x1xi32, #tpu.memory_space<vmem>>, vector<16x1xi32>
    %1 = tpu.iota {dimensions = array<i32: 1>} : vector<16x64xi32>
    %2 = vector.broadcast %0 : vector<16x1xi32> to vector<16x64xi32>
    %3 = arith.cmpi eq, %1, %2 : vector<16x64xi32>
    %4 = arith.extui %3 : vector<16x64xi1> to vector<16x64xi32>
    %5 = arith.sitofp %4 : vector<16x64xi32> to vector<16x64xf32>
    %6 = arith.truncf %5 : vector<16x64xf32> to vector<16x64xbf16>
    %c0_1 = arith.constant 0 : index
    %c0_2 = arith.constant 0 : index
    %7 = vector.load %arg3[%c0_1, %c0_2] : memref<64x128xbf16, #tpu.memory_space<vmem>>, vector<64x128xbf16>
    %cst = arith.constant dense<0.000000e+00> : vector<16x128xf32>
    %8 = tpu.matmul %6, %7, %cst {dimension_numbers = #tpu.dot_dimension_numbers<[1], [0], [0], [1], [0, 0, 1, 1], [], []>} : vector<16x64xbf16>, vector<64x128xbf16>, vector<16x128xf32> -> vector<16x128xf32>
    %c0_3 = arith.constant 0 : index
    %c0_4 = arith.constant 0 : index
    %9 = vector.load %arg4[%c0_3, %c0_4] : memref<16x128xf32, #tpu.memory_space<vmem>>, vector<16x128xf32>
    %10 = arith.addf %8, %9 : vector<16x128xf32>
    %c0_5 = arith.constant 0 : index
    %c0_6 = arith.constant 0 : index
    %11 = vector.load %arg2[%c0_5, %c0_6] : memref<16x1xi32, #tpu.memory_space<vmem>>, vector<16x1xi32>
    %c0_7 = arith.constant 0 : index
    %c0_8 = arith.constant 0 : index
    %12 = vector.load %arg5[%c0_7, %c0_8] : memref<2x128xf32, #tpu.memory_space<vmem>>, vector<2x128xf32>
    %c0_i32 = arith.constant 0 : i32
    %13 = vector.broadcast %c0_i32 : i32 to vector<16x1xi32>
    %14 = arith.cmpi eq, %11, %13 : vector<16x1xi32>
    %15 = arith.extui %14 : vector<16x1xi1> to vector<16x1xi32>
    %16 = arith.sitofp %15 : vector<16x1xi32> to vector<16x1xf32>
    %17 = vector.extract_strided_slice %12 {offsets = [0, 0], sizes = [1, 128], strides = [1, 1]} : vector<2x128xf32> to vector<1x128xf32>
    %18 = vector.broadcast %16 : vector<16x1xf32> to vector<16x128xf32>
    %19 = vector.broadcast %17 : vector<1x128xf32> to vector<16x128xf32>
    %20 = arith.mulf %18, %19 : vector<16x128xf32>
    %21 = arith.addf %10, %20 : vector<16x128xf32>
    %c1_i32 = arith.constant 1 : i32
    %22 = vector.broadcast %c1_i32 : i32 to vector<16x1xi32>
    %23 = arith.cmpi eq, %11, %22 : vector<16x1xi32>
    %24 = arith.extui %23 : vector<16x1xi1> to vector<16x1xi32>
    %25 = arith.sitofp %24 : vector<16x1xi32> to vector<16x1xf32>
    %26 = vector.extract_strided_slice %12 {offsets = [1, 0], sizes = [1, 128], strides = [1, 1]} : vector<2x128xf32> to vector<1x128xf32>
    %27 = vector.broadcast %25 : vector<16x1xf32> to vector<16x128xf32>
    %28 = vector.broadcast %26 : vector<1x128xf32> to vector<16x128xf32>
    %29 = arith.mulf %27, %28 : vector<16x128xf32>
    %30 = arith.addf %21, %29 : vector<16x128xf32>
    %cst_9 = arith.constant dense<0.000000e+00> : vector<16xf32>
    %31 = vector.multi_reduction <add>, %30, %cst_9 [1] : vector<16x128xf32> to vector<16xf32>
    %32 = vector.shape_cast %31 : vector<16xf32> to vector<16x1xf32>
    %cst_10 = arith.constant 1.280000e+02 : f32
    %33 = vector.broadcast %cst_10 : f32 to vector<16x1xf32>
    %34 = arith.divf %32, %33 : vector<16x1xf32>
    %35 = vector.broadcast %34 : vector<16x1xf32> to vector<16x128xf32>
    %36 = arith.subf %30, %35 : vector<16x128xf32>
    %37 = arith.mulf %36, %36 : vector<16x128xf32>
    %cst_11 = arith.constant dense<0.000000e+00> : vector<16xf32>
    %38 = vector.multi_reduction <add>, %37, %cst_11 [1] : vector<16x128xf32> to vector<16xf32>
    %39 = vector.shape_cast %38 : vector<16xf32> to vector<16x1xf32>
    %cst_12 = arith.constant 1.280000e+02 : f32
    %40 = vector.broadcast %cst_12 : f32 to vector<16x1xf32>
    %41 = arith.divf %39, %40 : vector<16x1xf32>
    %cst_13 = arith.constant 9.99999996E-13 : f32
    %42 = vector.broadcast %cst_13 : f32 to vector<16x1xf32>
    %43 = arith.addf %41, %42 : vector<16x1xf32>
    %44 = math.rsqrt %43 : vector<16x1xf32>
    %c0_14 = arith.constant 0 : index
    %c0_15 = arith.constant 0 : index
    %45 = vector.load %arg6[%c0_14, %c0_15] : memref<1x128xf32, #tpu.memory_space<vmem>>, vector<1x128xf32>
    %46 = vector.broadcast %44 : vector<16x1xf32> to vector<16x128xf32>
    %47 = vector.broadcast %45 : vector<1x128xf32> to vector<16x128xf32>
    %48 = arith.mulf %46, %47 : vector<16x128xf32>
    %49 = arith.mulf %36, %48 : vector<16x128xf32>
    %c0_16 = arith.constant 0 : index
    %c0_17 = arith.constant 0 : index
    %50 = vector.load %arg7[%c0_16, %c0_17] : memref<1x128xf32, #tpu.memory_space<vmem>>, vector<1x128xf32>
    %51 = vector.broadcast %50 : vector<1x128xf32> to vector<16x128xf32>
    %52 = arith.addf %49, %51 : vector<16x128xf32>
    %c0_18 = arith.constant 0 : index
    %c0_19 = arith.constant 0 : index
    %53 = vector.load %arg8[%c0_18, %c0_19] : memref<16x128xf32, #tpu.memory_space<vmem>>, vector<16x128xf32>
    tpu.vector_store %arg8[%c0_18, %c0_19], %52 {strides = array<i32>} : memref<16x128xf32, #tpu.memory_space<vmem>>, vector<16x128xf32>,
    return
  }
  func.func @transform_0(%arg0: i32) -> (i32, i32) {
    %c0_i32 = arith.constant 0 : i32
    %c0_i32_0 = arith.constant 0 : i32
    %c0_i32_1 = arith.constant 0 : i32
    return %c0_i32, %c0_i32_0 : i32, i32
  }
  func.func @transform_1(%arg0: i32) -> (i32, i32) {
    %c0_i32 = arith.constant 0 : i32
    %c0_i32_0 = arith.constant 0 : i32
    %c0_i32_1 = arith.constant 0 : i32
    return %c0_i32, %c0_i32_0 : i32, i32
  }
  func.func @transform_2(%arg0: i32) -> (i32, i32) {
    %c0_i32 = arith.constant 0 : i32
    %c0_i32_0 = arith.constant 0 : i32
    %c0_i32_1 = arith.constant 0 : i32
    return %c0_i32, %c0_i32_0 : i32, i32
  }
  func.func @transform_3(%arg0: i32) -> (i32, i32) {
    %c0_i32 = arith.constant 0 : i32
    %c0_i32_0 = arith.constant 0 : i32
    %c0_i32_1 = arith.constant 0 : i32
    return %c0_i32, %c0_i32_0 : i32, i32
  }
  func.func @transform_4(%arg0: i32) -> (i32, i32) {
    %c0_i32 = arith.constant 0 : i32
    %c0_i32_0 = arith.constant 0 : i32
    %c0_i32_1 = arith.constant 0 : i32
    return %c0_i32, %c0_i32_0 : i32, i32
  }
  func.func @transform_5(%arg0: i32) -> (i32, i32) {
    %c0_i32 = arith.constant 0 : i32
    %c0_i32_0 = arith.constant 0 : i32
    %c0_i32_1 = arith.constant 0 : i32
    return %c0_i32, %c0_i32_0 : i32, i32
  }
  func.func @transform_6(%arg0: i32) -> (i32, i32) {
    %c0_i32 = arith.constant 0 : i32
    %c0_i32_0 = arith.constant 0 : i32
    %c0_i32_1 = arith.constant 0 : i32
    return %c0_i32, %c0_i32_0 : i32, i32
  }
  func.func @transform_7(%arg0: i32) -> (i32, i32) {
    %c0_i32 = arith.constant 0 : i32
    %c0_i32_0 = arith.constant 0 : i32
    %c0_i32_1 = arith.constant 0 : i32
    return %c0_i32, %c0_i32_0 : i32, i32
  }
}

</mosaic_0001>

<bundles_post_ra>
// kernel: tpu_custom_call.1
= control target key start
LH: loop header
LB: loop body
LE: loop exit
PB: predicated region body
PF: predicated region fallthrough
CT: control target
= control target key end

     0   :  { %12 = vsyncpa [#allocation3], 0  ;;  %s464_s0 = inlined_call_operand.vmem [shape: s32[16,1], index: 0, kind: input, shape index: {}]   ;;  %s465_s1 = inlined_call_operand.vmem [shape: s32[16,1], index: 1, kind: input, shape index: {}]   ;;  %s466_s2 = inlined_call_operand.vmem [shape: bf16[64,128], index: 2, kind: input, shape index: {}]   ;;  %s467_s3 = inlined_call_operand.hbm [shape: f32[16,128], index: 3, kind: input, shape index: {}]   ;;  %s468_s4 = inlined_call_operand.vmem [shape: f32[2,128], index: 4, kind: input, shape index: {}]   ;;  %s469_s5 = inlined_call_operand.vmem [shape: f32[1,128], index: 5, kind: input, shape index: {}]   ;;  %s470_s6 = inlined_call_operand.vmem [shape: f32[1,128], index: 6, kind: input, shape index: {}]   ;;  %s471_s7 = inlined_call_operand.hbm [shape: f32[16,128], index: 7, kind: output, shape index: {}]  }
   0x1   :  { %13 = vsyncpa [#allocation4], 0  ;;  %s354_s24 = smov [#allocation2]   ;;  %s306_s28 = scalar_lea.hbm %s467_s3, 256 }
   0x2   :  { %s25_s25 = sshll.u32 %s354_s24, 4  ;;  %p307_p0 = scmp.ne.s32.totalorder %s467_s3, %s306_s28  ;;  %s26_s25 = int_to_ptr.vmem [resolvable:$true] %s25_s25 }
   0x3   :  { %p310_p1 = scmp.lt.u32.totalorder %s306_s28, %s467_s3 }
   0x5   :  { %p312_p2 = pnand %p310_p1, %p307_p0 }
   0x7   :  { %315 = shalt.err (!%p312_p2)
}
   0x8   :  { %s316_s10 = scalar_lea.vmem %s26_s25, 256  ;;  %p321_p4 = scmp.lt.s32.totalorder %s26_s25, %s26_s25 }
   0x9   :  { %p317_p3 = scmp.ne.s32.totalorder %s26_s25, %s316_s10  ;;  %p322_p5 = scmp.lt.s32.totalorder %s316_s10, %s316_s10 }
   0xb   :  { %p323_p6 = por %p322_p5, %p321_p4 }
   0xd   :  { %p324_p7 = pnand %p323_p6, %p317_p3 }
   0xf   :  { %327 = shalt.err (!%p324_p7)
}
  0x10   :  { %s355_s11 = smov 128   ;;  %s356_s12 = smov 8  }
  0x11   :  { %31 = dma.hbm_to_vmem [thread:$0]  %s467_s3, 256, %s26_s25, [#allocation3], %s355_s11, %s355_s11, %s356_s12  }
  0x12   :  { %350 = dma.done.wait [#allocation3], 256  }
  0x13   :  { %351 = vsyncadd [#allocation3], 4294967040  ;;  %v357_v0 = vmov 0   ;;  %v358_v1 = vmov 0.0   ;;  %v42_v2 = vld [vmem:[%s464_s0] sm:$0xff]  ;;  %v43_v4 = vld [vmem:[%s464_s0 + $0x8] sm:$0xff]  ;;  %v44_v16 = vlaneseq }
  0x14   :  { %286 = vset.pattern.permute.xlu0 %v357_v0  ;;  %267 = vmatprep.subr.bf16.mxu0 %v358_v1  ;;  %v298_v3 = vld [vmem:[%s466_s2] sm:$0xff]   ;;  %v299_v5 = vld [vmem:[%s466_s2 + $0x8] sm:$0xff]   ;;  %v300_v6 = vld [vmem:[%s466_s2 + $0x10] sm:$0xff]   ;;  %vm359_vm0 = vmmov 0   ;;  %vm93_vm7 = vcmask 523264   ;;  %s360_s9 = smov [#allocation5]  }
  0x15   :  { %287 = vset.pattern.permute.xlu1 %v357_v0  ;;  %47 = vperm.xlu0 %286, %v42_v2   ;;  %v138_v7 = vld [vmem:[%s465_s1] sm:$0xff]  ;;  %v139_v8 = vld [vmem:[%s465_s1 + $0x8] sm:$0xff]  ;;  %v301_v9 = vld [vmem:[%s466_s2 + $0x18] sm:$0xff]   ;;  %v45_v17 = vand.u32 127, %v44_v16  ;;  %v158_v23 = vshrl.u32 %v44_v16, 7  ;;  %s237_s10 = sshll.u32 %s360_s9, 4  ;;  %s238_s10 = int_to_ptr.vmem [resolvable:$true] %s237_s10 }
  0x16   :  { %268 = vmatpush3.bf16.msra.mxu0 %v298_v3  ;;  %275 = vmatprep.mubr.msk.bf16.mxu0 %vm359_vm0, %v358_v1  ;;  %vm141_vm1 = vcmp.eq.s32.totalorder %v138_v7, 0  ;;  %vm142_vm2 = vcmp.eq.s32.totalorder %v139_v8, 0  ;;  %vm165_vm3 = vcmp.eq.s32.totalorder %v138_v7, 1  ;;  %vm166_vm4 = vcmp.eq.s32.totalorder %v139_v8, 1  ;;  %v140_v26 = vld [vmem:[%s468_s4] sm:$0x3]  ;;  %p333_p9 = scmp.lt.s32.totalorder %s238_s10, %s238_s10 }
  0x17   :  { %269 = vmatprep.subr.bf16.mxu0 %v358_v1  ;;  %v256_v10 = vsel %vm141_vm1, 1.0, %v358_v1  ;;  %v257_v11 = vsel %vm142_vm2, 1.0, %v358_v1  ;;  %v258_v12 = vsel %vm165_vm3, 1.0, %v358_v1  ;;  %v259_v13 = vsel %vm166_vm4, 1.0, %v358_v1  ;;  %v67_v31 = vld [vmem:[#allocation2] sm:$0xff]  ;;  %v68_v36 = vld [vmem:[#allocation2 + $0x8] sm:$0xff] }
  0x18   :  { %v288_v14 = vpack.i.bf16 %v257_v11, %v256_v10  ;;  %v293_v15 = vpack.i.bf16 %v259_v13, %v258_v12  ;;  %v159_v25 = vsub.s32 0, %v158_v23  ;;  %v183_v27 = vsub.s32 1, %v158_v23  ;;  %s328_s13 = scalar_lea.vmem %s238_s10, 256 }
  0x19   :  { %50 = vperm.xlu0 %286, %v43_v4   ;;  %v261_v4 = vld [vmem:[%s470_s6] ss:$0 sm:$0xff]  ;;  %p329_p8 = scmp.ne.s32.totalorder %s238_s10, %s328_s13  ;;  %p334_p10 = scmp.lt.s32.totalorder %s328_s13, %s328_s13 }
  0x1a   :  { %270 = vmatpush3.bf16.msra.mxu0 %v299_v5  ;;  %289 = vperm.xlu1 %287, %v288_v14   ;;  %v160_v29 = vrot.slane %v140_v26, %v159_v25  ;;  %v184_v34 = vrot.slane %v140_v26, %v183_v27 }
  0x1b   :  { %271 = vmatprep.subr.bf16.mxu0 %v358_v1  ;;  %p335_p11 = por %p334_p10, %p333_p9 }
  0x1d   :  { %p336_p12 = pnand %p335_p11, %p329_p8 }
  0x1e   :  { %272 = vmatpush3.bf16.msra.mxu0 %v300_v6  ;;  %294 = vperm.xlu1 %287, %v293_v15  }
  0x1f   :  { %273 = vmatprep.subr.bf16.mxu0 %v358_v1 }
  0x22   :  { %274 = vmatpush3.bf16.msra.mxu0 %v301_v9 }
  0x94   :  { %v48_v18 = vpop.permute.xlu0 %47 }
  0x95   :  { %vm52_vm5 = vcmp.eq.s32.totalorder %v45_v17, %v48_v18 }
  0x96   :  { %v249_v20 = vsel %vm52_vm5, 1.0, %v358_v1 }
  0x98   :  { %v51_v19 = vpop.permute.xlu0 %50 }
  0x99   :  { %vm53_vm6 = vcmp.eq.s32.totalorder %v45_v17, %v51_v19  ;;  %v290_v24 = vpop.permute.xlu1 %289 }
  0x9a   :  { %v250_v21 = vsel %vm53_vm6, 1.0, %v358_v1  ;;  %v291_v30 = vunpack.i.l.bf16 %v290_v24  ;;  %v292_v32 = vunpack.i.h.bf16 %v290_v24  ;;  %v260_v1 = vld [vmem:[%s469_s5] ss:$0 sm:$0xff] }
  0x9b   :  { %v58_v22 = vpack.c.bf16 %v250_v21, %v249_v20 }
  0x9c   :  { %v161_v37 = vmul.f32 %v291_v30, %v160_v29  ;;  %v162_v42 = vmul.f32 %v292_v32, %v160_v29 }
  0x9d   :  { %276 = vmatmul.mubr.msk.bf16.vlgmr.msra.gmra.mrb[0].mxu0 %vm93_vm7, %v58_v22  ;;  %v295_v28 = vpop.permute.xlu1 %294 }
  0x9e   :  { %v296_v33 = vunpack.i.l.bf16 %v295_v28  ;;  %v297_v38 = vunpack.i.h.bf16 %v295_v28 }
  0xa0   :  { %v185_v46 = vmul.f32 %v296_v33, %v184_v34  ;;  %v186_v49 = vmul.f32 %v297_v38, %v184_v34 }
 0x170   :  { %v131_v35 = vpop.f32.mrb[0].mxu0 }
 0x171   :  { %v132_v39 = vadd.f32 %v131_v35, %v67_v31  ;;  %v277_v40 = vpop.f32.mrb[1].mxu0 }
 0x172   :  { %v134_v41 = vpop.f32.mrb[2].mxu0 }
 0x173   :  { %v163_v43 = vadd.f32 %v161_v37, %v132_v39  ;;  %v135_v44 = vadd.f32 %v134_v41, %v68_v36  ;;  %v278_v45 = vpop.f32.mrb[3].mxu0 }
 0x175   :  { %v164_v47 = vadd.f32 %v162_v42, %v135_v44  ;;  %v187_v48 = vadd.f32 %v185_v46, %v163_v43 }
 0x177   :  { %189 = vadd.xlane.f32.xlu0 %v187_v48  ;;  %v188_v50 = vadd.f32 %v186_v49, %v164_v47 }
 0x179   :  { %191 = vadd.xlane.f32.xlu1 %v188_v50 }
 0x204   :  { %v190_v51 = vpop.xlane.xlu0 %189 }
 0x205   :  { %v194_v52 = vmul.f32 0.0078125, %v190_v51 }
 0x206   :  { %v192_v53 = vpop.xlane.xlu1 %191 }
 0x207   :  { %v196_v54 = vsub.f32 %v187_v48, %v194_v52  ;;  %v195_v55 = vmul.f32 0.0078125, %v192_v53 }
 0x209   :  { %v197_v56 = vsub.f32 %v188_v50, %v195_v55  ;;  %v198_v57 = vmul.f32 %v196_v54, %v196_v54 }
 0x20b   :  { %200 = vadd.xlane.f32.xlu0 %v198_v57  ;;  %v199_v58 = vmul.f32 %v197_v56, %v197_v56 }
 0x20f   :  { %202 = vadd.xlane.f32.xlu0 %v199_v58 }
 0x298   :  { %v201_v59 = vpop.xlane.xlu0 %200 }
 0x299   :  { %v204_v60 = vmul.f32 0.0078125, %v201_v59 }
 0x29b   :  { %v206_v61 = vadd.f32 1e-12, %v204_v60 }
 0x29c   :  { %v203_v62 = vpop.xlane.xlu0 %202 }
 0x29d   :  { %302 = vrsqrt.f32 %v206_v61  ;;  %v205_v63 = vmul.f32 0.0078125, %v203_v62 }
 0x29f   :  { %v207_v0 = vadd.f32 1e-12, %v205_v63 }
 0x2a1   :  { %304 = vrsqrt.f32 %v207_v0 }
 0x2a7   :  { %v303_v2 = vpop.eup %302 }
 0x2a8   :  { %v217_v3 = vmul.f32 %v303_v2, %v260_v1 }
 0x2aa   :  { %v219_v5 = vmul.f32 %v217_v3, %v196_v54 }
 0x2ab   :  { %v305_v6 = vpop.eup %304 }
 0x2ac   :  { %v218_v7 = vmul.f32 %v305_v6, %v260_v1  ;;  %v228_v8 = vadd.f32 %v261_v4, %v219_v5 }
 0x2ae   :  { %v220_v9 = vmul.f32 %v218_v7, %v197_v56  ;;  %230 = vst [vmem:[#allocation5] sm:$0xff] %v228_v8 }
 0x2b0   :  { %v229_v10 = vadd.f32 %v261_v4, %v220_v9 }
 0x2b2   :  { %231 = vst [vmem:[#allocation5 + $0x8] sm:$0xff] %v229_v10 }
 0x2b3   :  { %339 = shalt.err (!%p336_p12)
}
 0x2b4   :  { %s340_s14 = scalar_lea.hbm %s471_s7, 256 }
 0x2b5   :  { %p341_p13 = scmp.ne.s32.totalorder %s471_s7, %s340_s14  ;;  %p344_p0 = scmp.lt.u32.totalorder %s340_s14, %s471_s7 }
 0x2b7   :  { %p346_p1 = pnand %p344_p0, %p341_p13 }
 0x2b9   :  { %349 = shalt.err (!%p346_p1)
}
 0x2ba   :  { %243 = dma.vmem_to_hbm [thread:$0]  %s238_s10, 256, %s471_s7, [#allocation4], %s355_s11, %s355_s11, %s356_s12  }
 0x2bb   :  { %352 = dma.done.wait [#allocation4], 256  }
 0x2bc   :  { %353 = vsyncadd [#allocation4], 4294967040 }
 0x2bd   :  { %247 = vsyncpa [#allocation3], 1 }
 0x2be   :  { %248 = vsyncpa [#allocation4], 1 }

</bundles_post_ra>
